<compile_context>
chip_gen: v7x
topology: tpu7x:2x2x1
jax: 0.10.0
libtpu: 0.0.40
codegen_flags: <defaults>
</compile_context>

<pallas_src>
import functools

import jax
import jax.numpy as jnp
from jax.experimental import pallas as pl
from jax.experimental.pallas import tpu as pltpu


# ---------------------------------------------------------------------------
# Activations (mirrors the NONLINEARITIES table used by the PyTorch module).
# Kernel versions are tuned for TPU unit balance; reference versions are the
# plain definitions used for host-side checking.
# ---------------------------------------------------------------------------
KERNEL_NONLINEARITIES = {
    "ReLU": lambda x: jnp.maximum(x, 0.0),
    "Tanh": jnp.tanh,
    # Clamp the exp argument: the where() already selects x for x > 0, so the
    # exp branch only has to be right for x <= 0 (avoids inf EUP work).
    "ELU": lambda x: jnp.where(x > 0, x, jnp.exp(jnp.minimum(x, 0.0)) - 1.0),
    # One EUP push (tanh) + cheap VALU mul/add instead of exp + reciprocal.
    "Sigmoid": lambda x: 0.5 * (jnp.tanh(0.5 * x) + 1.0),
}

REF_NONLINEARITIES = {
    "ReLU": lambda x: jnp.maximum(x, 0.0),
    "Tanh": jnp.tanh,
    "ELU": lambda x: jnp.where(x > 0, x, jnp.exp(x) - 1.0),
    "Sigmoid": lambda x: 1.0 / (1.0 + jnp.exp(-x)),
}


# ---------------------------------------------------------------------------
# Fused MLP kernel in transposed layout:
#   h0 = x^T (K, tm);  h_{l+1} = act(W_l @ h_l + b_l);  last layer has no act.
# refs = (xT_ref, w0, b0, w1, b1, ..., oT_ref).  Weights are (out, in) full
# blocks, biases are (out, 1) columns; both are grid-invariant.
# ---------------------------------------------------------------------------
def _gnf_mlp_kernel(*refs, n_layers, act_name):
    x_ref = refs[0]
    o_ref = refs[-1]
    param_refs = refs[1:-1]
    act = KERNEL_NONLINEARITIES[act_name]

    h = x_ref[...]  # (K, tm): batch on the lane dim
    for li in range(n_layers):
        w_ref = param_refs[2 * li]       # (N, K)
        b_ref = param_refs[2 * li + 1]   # (N, 1)
        if h.dtype != w_ref.dtype:       # no-op cast on the default f32 path
            h = h.astype(w_ref.dtype)
        # (N, tm) = (N, K) @ (K, tm): MXU matmul, f32 accumulation.
        h = jnp.dot(w_ref[...], h, preferred_element_type=jnp.float32)
        h = h + b_ref[...].astype(jnp.float32)   # lane-dense bias broadcast
        if li < n_layers - 1:  # layers.pop() removed the trailing activation
            h = act(h)
    o_ref[...] = h.astype(o_ref.dtype)


def _pick_batch_tile(batch):
    """Batch lives on the lane (last) dim.

    * Small batches: one block equal to the full array extent (no 128-alignment
      requirement when the block equals the full dim).
    * Large batches: 128-aligned tiles sized so there are >= 2 grid steps
      (lets both v7x TensorCores work on the 'parallel' axis), capped at 4096
      lanes to amortize the ~0.35us per-grid-step overhead.  Even at the cap a
      double-buffered (16, 4096)+(4, 4096) f32 tile is well under 1 MiB.
    """
    if batch < 256:
        return batch
    half = (batch + 1) // 2
    tm = ((half + 127) // 128) * 128
    return min(tm, 4096)


def gnf_mlp_forward(params, x, act_type, *, compute_dtype=None):
    """Fused forward pass: Linear -> act -> ... -> Linear (no act after last).

    params: list of (w, b) with w shaped (out_features, in_features) — same as
            torch.nn.Linear.weight — and b shaped (out_features,).
    x: (B, input_dim).
    compute_dtype: optional jnp.bfloat16, v6e/v7x only and only worthwhile if
            hidden dims grow to >= 128; default f32 (accumulation is f32
            regardless).  Do NOT use bf16 on v5e (no bf16 VPU/EUP).
    """
    B, K = x.shape
    n_layers = len(params)
    out_dim = params[-1][0].shape[0]
    out_dtype = x.dtype

    tm = _pick_batch_tile(B)
    grid = (pl.cdiv(B, tm),)

    xt = x.T  # (K, B): batch on the lane dim inside the kernel

    if compute_dtype is not None:
        xt = xt.astype(compute_dtype)
        params = [(w.astype(compute_dtype), b) for w, b in params]

    flat_params = []
    in_specs = [pl.BlockSpec((K, tm), lambda i: (0, i))]
    for w, b in params:
        n_, k_ = w.shape
        flat_params.append(w)
        flat_params.append(b.reshape(n_, 1).astype(jnp.float32))
        # Grid-invariant full blocks with a constant index_map: fetched once,
        # resident in VMEM for the whole grid.
        in_specs.append(pl.BlockSpec((n_, k_), lambda i: (0, 0)))
        in_specs.append(pl.BlockSpec((n_, 1), lambda i: (0, 0)))

    kernel = functools.partial(
        _gnf_mlp_kernel, n_layers=n_layers, act_name=act_type
    )

    out_t = pl.pallas_call(
        kernel,
        out_shape=jax.ShapeDtypeStruct((out_dim, B), out_dtype),
        grid_spec=pltpu.PrefetchScalarGridSpec(
            num_scalar_prefetch=0,
            grid=grid,
            in_specs=in_specs,
            out_specs=pl.BlockSpec((out_dim, tm), lambda i: (0, i)),
        ),
        compiler_params=pltpu.CompilerParams(
            dimension_semantics=("parallel",),
        ),
    )(xt, *flat_params)

    return out_t.T  # back to the module's (B, output_dim) convention


# ---------------------------------------------------------------------------
# Parameter init matching nn.Linear (weight stored as (out, in), like PyTorch).
# ---------------------------------------------------------------------------
def init_gnf_mlp_params(key, input_dim, hidden_dim, output_dim):
    l1 = [input_dim] + list(hidden_dim)
    l2 = list(hidden_dim) + [output_dim]
    params = []
    for h1, h2 in zip(l1, l2):
        key, kw, kb = jax.random.split(key, 3)
        bound = 1.0 / (h1 ** 0.5)  # same scale as PyTorch default init
        w = jax.random.uniform(kw, (h2, h1), jnp.float32, -bound, bound)
        b = jax.random.uniform(kb, (h2,), jnp.float32, -bound, bound)
        params.append((w, b))
    return params


def gnf_mlp_reference(params, x, act_type):
    """Pure-JAX reference of the same math (PyTorch nn.Linear convention)."""
    act = REF_NONLINEARITIES[act_type]
    h = x
    for li, (w, b) in enumerate(params):
        h = h @ w.T + b
        if li < len(params) - 1:
            h = act(h)
    return h


# ---------------------------------------------------------------------------
# Main
# ---------------------------------------------------------------------------
if __name__ == "__main__":
    input_dim = 16
    hidden_dim = (32, 32)
    output_dim = 4

    key = jax.random.PRNGKey(0)
    key, kp = jax.random.split(key)
    params = init_gnf_mlp_params(kp, input_dim, hidden_dim, output_dim)

    # Cover: small single-block batch, a >=2-step cdiv grid with a partial
    # last block, and every supported activation.
    test_cases = [
        (8, "ReLU"),
        (384, "Tanh"),
        (8, "Sigmoid"),
        (8, "ELU"),
    ]

    for batch, act_type in test_cases:
        key, kx = jax.random.split(key)
        x = jax.random.normal(kx, (batch, input_dim), jnp.float32)

        out = gnf_mlp_forward(params, x, act_type)
        out = jax.block_until_ready(out)

        ref = gnf_mlp_reference(params, x, act_type)

        assert out.shape == (batch, output_dim), (out.shape, batch, output_dim)
        assert jnp.allclose(out, ref, atol=1e-4, rtol=1e-4), act_type

    print("KERNEL_OK")
</pallas_src>

<mosaic_0001>
module attributes {stable_mosaic.version = 11 : i64} {
  func.func @_gnf_mlp_kernel(%arg0: i32, %arg1: memref<16x8xf32, #tpu.memory_space<vmem>>, %arg2: memref<32x16xf32, #tpu.memory_space<vmem>>, %arg3: memref<32x1xf32, #tpu.memory_space<vmem>>, %arg4: memref<32x32xf32, #tpu.memory_space<vmem>>, %arg5: memref<32x1xf32, #tpu.memory_space<vmem>>, %arg6: memref<4x32xf32, #tpu.memory_space<vmem>>, %arg7: memref<4x1xf32, #tpu.memory_space<vmem>>, %arg8: memref<4x8xf32, #tpu.memory_space<vmem>>) attributes {dimension_semantics = [#tpu.dimension_semantics<parallel>], iteration_bounds = array<i64: 1>, scalar_prefetch = 0 : i64, scratch_operands = 0 : i64, tpu.core_type = #tpu.core_type<tc>, window_params = [{transform_indices = @transform_0, window_bounds = array<i64: 16, 8>}, {pipeline_mode = #tpu.pipeline_mode<synchronous>, transform_indices = @transform_1, window_bounds = array<i64: 32, 16>}, {pipeline_mode = #tpu.pipeline_mode<synchronous>, transform_indices = @transform_2, window_bounds = array<i64: 32, 1>}, {pipeline_mode = #tpu.pipeline_mode<synchronous>, transform_indices = @transform_3, window_bounds = array<i64: 32, 32>}, {pipeline_mode = #tpu.pipeline_mode<synchronous>, transform_indices = @transform_4, window_bounds = array<i64: 32, 1>}, {pipeline_mode = #tpu.pipeline_mode<synchronous>, transform_indices = @transform_5, window_bounds = array<i64: 4, 32>}, {pipeline_mode = #tpu.pipeline_mode<synchronous>, transform_indices = @transform_6, window_bounds = array<i64: 4, 1>}, {transform_indices = @transform_7, window_bounds = array<i64: 4, 8>}]} {
    %c0 = arith.constant 0 : index
    %c0_0 = arith.constant 0 : index
    %0 = vector.load %arg1[%c0, %c0_0] : memref<16x8xf32, #tpu.memory_space<vmem>>, vector<16x8xf32>
    %c0_1 = arith.constant 0 : index
    %c0_2 = arith.constant 0 : index
    %1 = vector.load %arg2[%c0_1, %c0_2] : memref<32x16xf32, #tpu.memory_space<vmem>>, vector<32x16xf32>
    %cst = arith.constant dense<0.000000e+00> : vector<32x8xf32>
    %2 = tpu.matmul %1, %0, %cst {dimension_numbers = #tpu.dot_dimension_numbers<[1], [0], [0], [1], [0, 0, 1, 1], [], []>} : vector<32x16xf32>, vector<16x8xf32>, vector<32x8xf32> -> vector<32x8xf32>
    %c0_3 = arith.constant 0 : index
    %c0_4 = arith.constant 0 : index
    %3 = vector.load %arg3[%c0_3, %c0_4] : memref<32x1xf32, #tpu.memory_space<vmem>>, vector<32x1xf32>
    %4 = vector.broadcast %3 : vector<32x1xf32> to vector<32x8xf32>
    %5 = arith.addf %2, %4 : vector<32x8xf32>
    %cst_5 = arith.constant 0.000000e+00 : f32
    %6 = vector.broadcast %cst_5 : f32 to vector<32x8xf32>
    %7 = arith.maximumf %5, %6 : vector<32x8xf32>
    %c0_6 = arith.constant 0 : index
    %c0_7 = arith.constant 0 : index
    %8 = vector.load %arg4[%c0_6, %c0_7] : memref<32x32xf32, #tpu.memory_space<vmem>>, vector<32x32xf32>
    %cst_8 = arith.constant dense<0.000000e+00> : vector<32x8xf32>
    %9 = tpu.matmul %8, %7, %cst_8 {dimension_numbers = #tpu.dot_dimension_numbers<[1], [0], [0], [1], [0, 0, 1, 1], [], []>} : vector<32x32xf32>, vector<32x8xf32>, vector<32x8xf32> -> vector<32x8xf32>
    %c0_9 = arith.constant 0 : index
    %c0_10 = arith.constant 0 : index
    %10 = vector.load %arg5[%c0_9, %c0_10] : memref<32x1xf32, #tpu.memory_space<vmem>>, vector<32x1xf32>
    %11 = vector.broadcast %10 : vector<32x1xf32> to vector<32x8xf32>
    %12 = arith.addf %9, %11 : vector<32x8xf32>
    %cst_11 = arith.constant 0.000000e+00 : f32
    %13 = vector.broadcast %cst_11 : f32 to vector<32x8xf32>
    %14 = arith.maximumf %12, %13 : vector<32x8xf32>
    %c0_12 = arith.constant 0 : index
    %c0_13 = arith.constant 0 : index
    %15 = vector.load %arg6[%c0_12, %c0_13] : memref<4x32xf32, #tpu.memory_space<vmem>>, vector<4x32xf32>
    %cst_14 = arith.constant dense<0.000000e+00> : vector<4x8xf32>
    %16 = tpu.matmul %15, %14, %cst_14 {dimension_numbers = #tpu.dot_dimension_numbers<[1], [0], [0], [1], [0, 0, 1, 1], [], []>} : vector<4x32xf32>, vector<32x8xf32>, vector<4x8xf32> -> vector<4x8xf32>
    %c0_15 = arith.constant 0 : index
    %c0_16 = arith.constant 0 : index
    %17 = vector.load %arg7[%c0_15, %c0_16] : memref<4x1xf32, #tpu.memory_space<vmem>>, vector<4x1xf32>
    %18 = vector.broadcast %17 : vector<4x1xf32> to vector<4x8xf32>
    %19 = arith.addf %16, %18 : vector<4x8xf32>
    %c0_17 = arith.constant 0 : index
    %c0_18 = arith.constant 0 : index
    %20 = vector.load %arg8[%c0_17, %c0_18] : memref<4x8xf32, #tpu.memory_space<vmem>>, vector<4x8xf32>
    tpu.vector_store %arg8[%c0_17, %c0_18], %19 {strides = array<i32>} : memref<4x8xf32, #tpu.memory_space<vmem>>, vector<4x8xf32>,
    return
  }
  func.func @transform_0(%arg0: i32) -> (i32, i32) {
    %c0_i32 = arith.constant 0 : i32
    %c0_i32_0 = arith.constant 0 : i32
    return %c0_i32, %arg0 : i32, i32
  }
  func.func @transform_1(%arg0: i32) -> (i32, i32) {
    %c0_i32 = arith.constant 0 : i32
    %c0_i32_0 = arith.constant 0 : i32
    %c0_i32_1 = arith.constant 0 : i32
    return %c0_i32, %c0_i32_0 : i32, i32
  }
  func.func @transform_2(%arg0: i32) -> (i32, i32) {
    %c0_i32 = arith.constant 0 : i32
    %c0_i32_0 = arith.constant 0 : i32
    %c0_i32_1 = arith.constant 0 : i32
    return %c0_i32, %c0_i32_0 : i32, i32
  }
  func.func @transform_3(%arg0: i32) -> (i32, i32) {
    %c0_i32 = arith.constant 0 : i32
    %c0_i32_0 = arith.constant 0 : i32
    %c0_i32_1 = arith.constant 0 : i32
    return %c0_i32, %c0_i32_0 : i32, i32
  }
  func.func @transform_4(%arg0: i32) -> (i32, i32) {
    %c0_i32 = arith.constant 0 : i32
    %c0_i32_0 = arith.constant 0 : i32
    %c0_i32_1 = arith.constant 0 : i32
    return %c0_i32, %c0_i32_0 : i32, i32
  }
  func.func @transform_5(%arg0: i32) -> (i32, i32) {
    %c0_i32 = arith.constant 0 : i32
    %c0_i32_0 = arith.constant 0 : i32
    %c0_i32_1 = arith.constant 0 : i32
    return %c0_i32, %c0_i32_0 : i32, i32
  }
  func.func @transform_6(%arg0: i32) -> (i32, i32) {
    %c0_i32 = arith.constant 0 : i32
    %c0_i32_0 = arith.constant 0 : i32
    %c0_i32_1 = arith.constant 0 : i32
    return %c0_i32, %c0_i32_0 : i32, i32
  }
  func.func @transform_7(%arg0: i32) -> (i32, i32) {
    %c0_i32 = arith.constant 0 : i32
    %c0_i32_0 = arith.constant 0 : i32
    return %c0_i32, %arg0 : i32, i32
  }
}

</mosaic_0001>

<bundles_post_ra>
// kernel: tpu_custom_call.1
= control target key start
LH: loop header
LB: loop body
LE: loop exit
PB: predicated region body
PF: predicated region fallthrough
CT: control target
= control target key end

     0   :  { %vm57_vm0 = vcmask 130048   ;;  %v497_v4 = vmov 0   ;;  %s623_s0 = inlined_call_operand.vmem [shape: f32[16,8], index: 0, kind: input, shape index: {}]   ;;  %s624_s1 = inlined_call_operand.vmem [shape: f32[32,16], index: 1, kind: input, shape index: {}]   ;;  %s625_s2 = inlined_call_operand.vmem [shape: f32[32,1], index: 2, kind: input, shape index: {}]   ;;  %s626_s3 = inlined_call_operand.vmem [shape: f32[32,32], index: 3, kind: input, shape index: {}]   ;;  %s627_s4 = inlined_call_operand.vmem [shape: f32[32,1], index: 4, kind: input, shape index: {}]   ;;  %s628_s5 = inlined_call_operand.vmem [shape: f32[4,32], index: 5, kind: input, shape index: {}]   ;;  %s629_s6 = inlined_call_operand.vmem [shape: f32[4,1], index: 6, kind: input, shape index: {}]   ;;  %s630_s7 = inlined_call_operand.hbm [shape: f32[4,8], index: 7, kind: output, shape index: {}]  }
   0x1   :  { %v27_v0 = vld [vmem:[%s623_s0] sm:$0xff]  ;;  %v28_v1 = vld [vmem:[%s623_s0 + $0x8] sm:$0xff]  ;;  %471 = vset.pattern.permute.xlu0 %v497_v4  ;;  %472 = vset.pattern.permute.xlu1 %v497_v4  ;;  %v35_v6 = vld [vmem:[%s625_s2 + $0x10] sm:$0xff] }
   0x2   :  { %v29_v2 = vld [vmem:[%s624_s1] sm:$0xff]  ;;  %v448_v3 = vpack.c.bf16 %v28_v1, %v27_v0  ;;  %v30_v7 = vld [vmem:[%s624_s1 + $0x8] sm:$0xff]  ;;  %49 = vperm.xlu1 %472, %v35_v6   ;;  %v31_v9 = vld [vmem:[%s624_s1 + $0x10] sm:$0xff] }
   0x3   :  { %417 = vmatprep.mubr.msk.f32.mxu0 %vm57_vm0, %v29_v2  ;;  %v33_v5 = vld [vmem:[%s625_s2] sm:$0xff]  ;;  %v34_v8 = vld [vmem:[%s625_s2 + $0x8] sm:$0xff]  ;;  %v36_v10 = vld [vmem:[%s625_s2 + $0x18] sm:$0xff] }
   0x4   :  { %449 = vmatprep.subr.bf16.mxu0 %v448_v3  ;;  %39 = vperm.xlu0 %471, %v33_v5  }
   0x5   :  { %451 = vmatpush3.bf16.msra.mxu0 %v448_v3 }
   0x6   :  { %12 = vsyncpa [#allocation3], 0  ;;  %v32_v11 = vld [vmem:[%s624_s1 + $0x18] sm:$0xff]  ;;  %v163_v12 = vld [vmem:[%s627_s4] sm:$0xff]  ;;  %54 = vperm.xlu1 %472, %v36_v10   ;;  %vm187_vm1 = vcmask 261120   ;;  %v498_v39 = vmov 0.0|0.0  }
   0x7   :  { %v164_v13 = vld [vmem:[%s627_s4 + $0x8] sm:$0xff]  ;;  %v165_v14 = vld [vmem:[%s627_s4 + $0x10] sm:$0xff]  ;;  %v166_v15 = vld [vmem:[%s627_s4 + $0x18] sm:$0xff]  ;;  %460 = vmatprep.subr.bf16.mxu0 %v498_v39  ;;  %vm499_vm2 = vmmov 0   ;;  %v500_v40 = vmov 0.0   ;;  %s501_s11 = smov [#allocation2]  }
   0x8   :  { %418 = vmatmul.mubr.msk.f32.vlgmr.msra.gmra.mrb[0].mxu0 %vm57_vm0, %v30_v7  ;;  %44 = vperm.xlu0 %471, %v34_v8   ;;  %v290_v16 = vld [vmem:[%s629_s6] sm:$0xf]  ;;  %v160_v36 = vld [vmem:[%s626_s3 + $0x8] sm:$0xff]  ;;  %v161_v37 = vld [vmem:[%s626_s3 + $0x10] sm:$0xff]  ;;  %s377_s12 = sshll.u32 %s501_s11, 4  ;;  %vm369_vm3 = vcmask 60416   ;;  %s378_s12 = int_to_ptr.vmem [resolvable:$true] %s377_s12 }
   0x9   :  { %420 = vmatprep.mubr.msk.f32.mxu0 %vm57_vm0, %v31_v9  ;;  %v159_v17 = vld [vmem:[%s626_s3] sm:$0xff]  ;;  %v162_v38 = vld [vmem:[%s626_s3 + $0x18] sm:$0xff]  ;;  %s473_s13 = scalar_lea.vmem %s378_s12, 64  ;;  %p478_p1 = scmp.lt.s32.totalorder %s378_s12, %s378_s12 }
   0xa   :  { %174 = vperm.xlu1 %472, %v164_v13   ;;  %431 = vmatprep.mubr.msk.f32.mxu1 %vm187_vm1, %v159_v17  ;;  %v289_v59 = vld [vmem:[%s628_s5] sm:$0xf]  ;;  %p474_p0 = scmp.ne.s32.totalorder %s378_s12, %s473_s13  ;;  %p479_p2 = scmp.lt.s32.totalorder %s473_s13, %s473_s13 }
   0xc   :  { %421 = vmatmul.mubr.msk.f32.gmra.mrb[2].mxu0 %vm57_vm0, %v32_v11  ;;  %169 = vperm.xlu0 %471, %v163_v12   ;;  %p480_p3 = por %p479_p2, %p478_p1 }
   0xd   :  { %445 = vmatprep.mubr.msk.f32.mxu0 %vm499_vm2, %v500_v40 }
   0xe   :  { %184 = vperm.xlu1 %472, %v166_v15   ;;  %p481_p4 = pnand %p480_p3, %p474_p0 }
  0x10   :  { %179 = vperm.xlu0 %471, %v165_v14  }
  0x14   :  { %293 = vperm.xlu0 %471, %v290_v16  }
  0x81   :  { %v50_v19 = vpop.permute.xlu1 %49 }
  0x83   :  { %v40_v18 = vpop.permute.xlu0 %39 }
  0x85   :  { %v55_v26 = vpop.permute.xlu1 %54 }
  0x87   :  { %v45_v20 = vpop.permute.xlu0 %44 }
  0x89   :  { %v175_v41 = vpop.permute.xlu1 %174 }
  0x8b   :  { %v170_v42 = vpop.permute.xlu0 %169 }
  0x8d   :  { %v185_v48 = vpop.permute.xlu1 %184 }
  0x8f   :  { %v180_v51 = vpop.permute.xlu0 %179 }
  0x93   :  { %v294_v60 = vpop.permute.xlu0 %293 }
  0xdb   :  { %v419_v21 = vpop.f32.mrb[0].mxu0 }
  0xdc   :  { %v142_v22 = vadd.f32 %v419_v21, %v45_v20  ;;  %v136_v23 = vpop.f32.mrb[1].mxu0 }
  0xdd   :  { %v137_v24 = vadd.f32 %v136_v23, %v40_v18 }
  0xde   :  { %v156_v25 = vmax.f32 %v142_v22, 0.0 }
  0xdf   :  { %v155_v27 = vmax.f32 %v137_v24, 0.0  ;;  %v422_v28 = vpop.f32.mrb[2].mxu0 }
  0xe0   :  { %v152_v29 = vadd.f32 %v422_v28, %v55_v26  ;;  %v146_v30 = vpop.f32.mrb[3].mxu0 }
  0xe1   :  { %v147_v31 = vadd.f32 %v146_v30, %v50_v19  ;;  %v452_v32 = vpack.c.bf16 %v156_v25, %v155_v27 }
  0xe2   :  { %v158_v33 = vmax.f32 %v152_v29, 0.0 }
  0xe3   :  { %v157_v34 = vmax.f32 %v147_v31, 0.0  ;;  %453 = vmatprep.subr.bf16.mxu1 %v452_v32 }
  0xe4   :  { %455 = vmatpush3.bf16.msra.mxu1 %v452_v32 }
  0xe5   :  { %v456_v35 = vpack.c.bf16 %v158_v33, %v157_v34 }
  0xe7   :  { %457 = vmatprep.subr.bf16.mxu1 %v456_v35 }
  0xe8   :  { %459 = vmatpush3.bf16.msra.mxu1 %v456_v35 }
  0xeb   :  { %432 = vmatmul.mubr.msk.f32.vlgmr.msra.gmra.mrb[0].mxu1 %vm187_vm1, %v160_v36 }
  0xec   :  { %434 = vmatprep.mubr.msk.f32.mxu1 %vm187_vm1, %v161_v37 }
  0xef   :  { %435 = vmatmul.mubr.msk.f32.gmra.mrb[2].mxu1 %vm187_vm1, %v162_v38 }
 0x1be   :  { %v433_v43 = vpop.f32.mrb[0].mxu1 }
 0x1bf   :  { %v272_v44 = vadd.f32 %v433_v43, %v175_v41  ;;  %v266_v45 = vpop.f32.mrb[1].mxu1 }
 0x1c0   :  { %v267_v46 = vadd.f32 %v266_v45, %v170_v42 }
 0x1c1   :  { %v286_v47 = vmax.f32 %v272_v44, 0.0 }
 0x1c2   :  { %v285_v49 = vmax.f32 %v267_v46, 0.0  ;;  %v436_v50 = vpop.f32.mrb[2].mxu1 }
 0x1c3   :  { %v282_v52 = vadd.f32 %v436_v50, %v185_v48  ;;  %v276_v53 = vpop.f32.mrb[3].mxu1 }
 0x1c4   :  { %v461_v54 = vpack.c.bf16 %v286_v47, %v285_v49  ;;  %v277_v55 = vadd.f32 %v276_v53, %v180_v51 }
 0x1c5   :  { %v288_v56 = vmax.f32 %v282_v52, 0.0 }
 0x1c6   :  { %v287_v57 = vmax.f32 %v277_v55, 0.0  ;;  %462 = vmatpush3.bf16.msra.mxu0 %v461_v54 }
 0x1c7   :  { %463 = vmatprep.subr.bf16.mxu0 %v498_v39 }
 0x1c8   :  { %v464_v58 = vpack.c.bf16 %v288_v56, %v287_v57 }
 0x1ca   :  { %465 = vmatpush3.bf16.msra.mxu0 %v464_v58 }
 0x1cd   :  { %446 = vmatmul.mubr.msk.f32.vlgmr.msra.gmra.mrb[4].mxu0 %vm187_vm1, %v289_v59 }
 0x2a0   :  { %v365_v61 = vpop.f32.mrb[4].mxu0 }
 0x2a1   :  { %v366_v62 = vadd.f32 %v365_v61, %v294_v60  ;;  %v447_v63 = vpop.f32.mrb[5].mxu0 }
 0x2a3   :  { %370 = vst.msk [vmem:[#allocation2] sm:$0xf] %vm369_vm3, %v366_v62 }
 0x2a4   :  { %484 = shalt.err (!%p481_p4)
}
 0x2a5   :  { %s485_s15 = scalar_lea.hbm %s630_s7, 64 }
 0x2a6   :  { %p486_p5 = scmp.ne.s32.totalorder %s630_s7, %s485_s15  ;;  %p489_p6 = scmp.lt.u32.totalorder %s485_s15, %s630_s7 }
 0x2a8   :  { %p491_p7 = pnand %p489_p6, %p486_p5 }
 0x2aa   :  { %494 = shalt.err (!%p491_p7)
}
 0x2ab   :  { %380 = dma.vmem_to_hbm [thread:$0]  %s378_s12, 64, %s630_s7, [#allocation3]  }
 0x2ac   :  { %495 = dma.done.wait [#allocation3], 64  }
 0x2ad   :  { %496 = vsyncadd [#allocation3], 4294967232 }
 0x2ae   :  { %384 = vsyncpa [#allocation3], 1 }

</bundles_post_ra>
